<compile_context>
chip_gen: v7x
topology: tpu7x:2x2x1
jax: 0.10.0
libtpu: 0.0.40
codegen_flags: <defaults>
</compile_context>

<pallas_src>
import functools
import math

import numpy as np

import jax
import jax.numpy as jnp
from jax import lax
from jax.experimental import pallas as pl
from jax.experimental.pallas import tpu as pltpu


_MASK_VALUE = -9e15  # same masking constant as the PyTorch module


def _round_up(v: int, m: int) -> int:
    return ((v + m - 1) // m) * m


def _vmem_cap_bytes() -> int:
    """Usable per-TensorCore VMEM budget (capacity minus headroom)."""
    try:
        cap = int(pltpu.get_tpu_info().vmem_capacity_bytes)
    except Exception:
        cap = 64 << 20          # conservative fallback == v7x's 64 MiB per TC
    return max(cap - (16 << 20), 32 << 20)


# ---------------------------------------------------------------------------
# Pass 1: fused projection   h = x @ W (+ bias),  f1 = h . a1,  f2 = h . a2
# ---------------------------------------------------------------------------
def _proj_kernel(x_ref, w_ref, b_ref, a1_ref, a2_ref, h_ref, f1_ref, f2_ref,
                 *, n_valid, block_p, add_bias):
    h = jnp.dot(x_ref[...], w_ref[...], preferred_element_type=jnp.float32)
    if add_bias:
        # Mask the bias by row validity so zero-padded rows of h stay exactly 0
        # (keeps padded columns inert in pass 2 even when bias != 0).
        row = (pl.program_id(0) * block_p
               + lax.broadcasted_iota(jnp.int32, (block_p, 1), 0))
        h = h + jnp.where(row < n_valid, 1.0, 0.0) * b_ref[...]
    # a1/a2 logit terms folded into this pass: VPU multiply + lane reduce
    # (avoids two lane-sparse (Fout,1) MXU matmuls).  f1/f2 stay f32.
    f1_ref[...] = jnp.sum(h * a1_ref[...], axis=1, keepdims=True)
    f2_ref[...] = jnp.sum(h * a2_ref[...], axis=1, keepdims=True)
    h_ref[...] = h.astype(h_ref.dtype)   # (bf16) operand for the att @ h matmul


# ---------------------------------------------------------------------------
# Pass 2: tiled masked attention, online softmax, block-sparse skip, ELU
# ---------------------------------------------------------------------------
def _attn_kernel(occ_ref, f1_ref, f2_ref, adj_ref, h_ref, out_ref,
                 m_ref, l_ref, *, alpha, block_n, n_col_tiles, h_resident,
                 approx_recip):
    i = pl.program_id(0)
    j = pl.program_id(1)

    @pl.when(j == 0)
    def _init():
        m_ref[...] = jnp.full(m_ref.shape, -jnp.inf, jnp.float32)
        l_ref[...] = jnp.zeros_like(l_ref)
        out_ref[...] = jnp.zeros_like(out_ref)   # f32 accumulator lives in out

    # Per-tile occupancy (SMEM scalar): skip fully masked adjacency tiles
    # (real graph sparsity plus the zero-padded row/column strips).
    @pl.when(occ_ref[i * n_col_tiles + j] != 0)
    def _compute():
        # e[r,c] = leakyrelu(f1[r] + f2[c]); masked to -9e15 where adj == 0.
        e = f1_ref[...] + f2_ref[...]            # (bm,1)+(1,bn) -> (bm,bn) f32
        e = jnp.maximum(e, alpha * e)            # LeakyReLU (alpha in (0,1))
        e = jnp.where(adj_ref[...] != 0, e, _MASK_VALUE)   # direct int8 compare

        # Online softmax update (all f32).  corr == 0 exactly when m_prev=-inf
        # (i.e. every earlier column tile of this row was skipped).
        m_prev = m_ref[...]
        m_new = jnp.maximum(m_prev, jnp.max(e, axis=1, keepdims=True))
        corr = jnp.exp(m_prev - m_new)
        p = jnp.exp(e - m_new)
        l_ref[...] = corr * l_ref[...] + jnp.sum(p, axis=1, keepdims=True)
        if h_resident:
            col0 = pl.multiple_of(j * block_n, block_n)
            h_tile = h_ref[pl.ds(col0, block_n), :]
        else:
            h_tile = h_ref[...]
        out_ref[...] = corr * out_ref[...] + jnp.dot(
            p.astype(h_tile.dtype), h_tile, preferred_element_type=jnp.float32)
        m_ref[...] = m_new

    @pl.when(j == pl.num_programs(1) - 1)
    def _finalize():
        # l >= 1 whenever any tile of this row was processed; the max() only
        # protects fully-skipped rows (padded rows / empty row tiles) from 0/0.
        inv_l = pl.reciprocal(jnp.maximum(l_ref[...], 1e-30), approx=approx_recip)
        hp = out_ref[...] * inv_l
        # ELU.  For x <= 0: expm1(x) == tanh(x/2) * (exp(x) + 1); accurate near
        # 0 and only uses exp/tanh (EUP slot, free under the VPU-bound regime).
        elu_neg = jnp.tanh(0.5 * hp) * (jnp.exp(hp) + 1.0)
        out_ref[...] = jnp.where(hp > 0, hp, elu_neg)


# ---------------------------------------------------------------------------
# Wrapper
# ---------------------------------------------------------------------------
def attn_graph_convolution(x, adj, W, a, *, bias=None, alpha=0.2,
                           mm_dtype=jnp.bfloat16, block_m=256, block_n=1024,
                           h_resident=None, adj_buffer_count=2):
    """Pallas forward of AttnGraphConvolution (eval mode).

    x: (N, Fin), adj: (N, N), W: (Fin, Fout), a: (2*Fout, 1)  ->  (N, Fout)

    mm_dtype:   MXU operand dtype (bf16 recommended; f32 accumulation always).
    block_m/n:  attention row/column tile sizes (multiples of 128).  They are
                auto-clamped to the padded graph size, and block_m is shrunk so
                the "parallel" row axis has >= 2 tiles for megacore / v7x.
    h_resident: keep h fully VMEM-resident across the reduction axis (None =
                auto, based on the per-core VMEM budget from get_tpu_info()).
    adj_buffer_count: pipeline depth for the adjacency stream (3 can help on
                v5e if a profile shows the adj DMA is exposed).
    """
    N, Fin = x.shape
    Fout = W.shape[1]
    assert W.shape == (Fin, Fout)
    assert a.shape == (2 * Fout, 1)
    assert adj.shape == (N, N)
    assert block_m % 128 == 0 and block_n % 128 == 0

    alpha = float(alpha)
    f32 = jnp.float32
    mm_bytes = np.dtype(mm_dtype).itemsize
    fout_p = _round_up(Fout, 128)                      # lane-dense h / out

    # ---- tile auto-selection -------------------------------------------------
    n128 = _round_up(N, 128)
    block_n = max(128, min(block_n, n128))
    block_m = max(128, min(block_m, n128))
    if n128 // block_m < 2 and n128 >= 256:
        # Keep >= 2 row tiles so the "parallel" row axis can span both
        # TensorCores on v7x (megacore sharding).
        block_m = max(128, ((n128 // 2) // 128) * 128)

    n_pad_m = _round_up(N, block_m)                    # rows (queries)
    n_pad_n = _round_up(N, block_n)                    # cols (keys / values)
    n_big = max(n_pad_m, n_pad_n)                      # pass-1 row padding
    block_p = next(bp for bp in (512, 256, 128) if n_big % bp == 0)

    vmem_cap = _vmem_cap_bytes()
    if h_resident is None:
        # Assume the pipeline may hold 2 copies of a constant-index input.
        h_resident = 2 * n_pad_n * fout_p * mm_bytes <= min(vmem_cap // 2, 40 << 20)

    # ---- parameter / operand padding ------------------------------------------
    W_p = jnp.zeros((Fin, fout_p), f32).at[:, :Fout].set(W.astype(f32))
    W_p = W_p.astype(mm_dtype)
    a1 = jnp.zeros((1, fout_p), f32).at[0, :Fout].set(a[:Fout, 0].astype(f32))
    a2 = jnp.zeros((1, fout_p), f32).at[0, :Fout].set(a[Fout:, 0].astype(f32))
    b_p = jnp.zeros((1, fout_p), f32)
    if bias is not None:
        b_p = b_p.at[0, :Fout].set(bias.astype(f32))

    x_p = jnp.zeros((n_big, Fin), mm_dtype).at[:N].set(x.astype(mm_dtype))
    adj_i8 = jnp.zeros((n_pad_m, n_pad_n), jnp.int8).at[:N, :N].set(
        (adj > 0).astype(jnp.int8))

    # ---- VMEM budgets (capped to the per-core capacity) -----------------------
    p1_est = (2 * (block_p * Fin + Fin * fout_p + block_p * fout_p) * mm_bytes
              + 4 * (block_p + fout_p) * 4)
    vmem_p1 = int(min(max(int(p1_est * 1.5) + (8 << 20), 32 << 20), vmem_cap))

    h_buf = (2 * n_pad_n if h_resident else 2 * block_n) * fout_p * mm_bytes
    p2_est = (2 * block_m * block_n + h_buf + 2 * (block_m + block_n) * 4
              + 2 * block_m * fout_p * 4 + 2 * block_m * 4)
    vmem_p2 = int(min(max(int(p2_est * 1.5) + (8 << 20), 32 << 20), vmem_cap))

    # ---- pass 1: projection + attention-logit terms ---------------------------
    proj = functools.partial(_proj_kernel, n_valid=N, block_p=block_p,
                             add_bias=bias is not None)
    h, f1, f2 = pl.pallas_call(
        proj,
        out_shape=(
            jax.ShapeDtypeStruct((n_big, fout_p), mm_dtype),   # h (MXU operand)
            jax.ShapeDtypeStruct((n_big, 1), f32),             # f1 = h . a1
            jax.ShapeDtypeStruct((n_big, 1), f32),             # f2 = h . a2
        ),
        grid_spec=pltpu.PrefetchScalarGridSpec(
            num_scalar_prefetch=0,
            grid=(n_big // block_p,),
            in_specs=[
                pl.BlockSpec((block_p, Fin), lambda i: (i, 0)),   # x row tile
                pl.BlockSpec((Fin, fout_p), lambda i: (0, 0)),    # W (resident)
                pl.BlockSpec((1, fout_p), lambda i: (0, 0)),      # bias
                pl.BlockSpec((1, fout_p), lambda i: (0, 0)),      # a1
                pl.BlockSpec((1, fout_p), lambda i: (0, 0)),      # a2
            ],
            out_specs=(
                pl.BlockSpec((block_p, fout_p), lambda i: (i, 0)),
                pl.BlockSpec((block_p, 1), lambda i: (i, 0)),
                pl.BlockSpec((block_p, 1), lambda i: (i, 0)),
            ),
        ),
        compiler_params=pltpu.CompilerParams(
            dimension_semantics=("parallel",), vmem_limit_bytes=vmem_p1),
    )(x_p, W_p, b_p, a1, a2)

    # (n_big,1) -> (1,n_big) keeps the same linear layout (metadata-only
    # reshape, no HBM transpose); pass 2 then reads f2 in lane-dense tiles.
    f2t = f2.reshape(1, n_big)

    # ---- per-tile occupancy (block-sparse skip table, prefetched to SMEM) -----
    n_tm = n_pad_m // block_m
    n_tn = n_pad_n // block_n
    occ = jnp.any(adj_i8.reshape(n_tm, block_m, n_tn, block_n) != 0, axis=(1, 3))
    occ_flat = occ.reshape(-1).astype(jnp.int32)

    # ---- pass 2: masked attention + online softmax + (att @ h) + ELU ----------
    if h_resident:
        h_spec = pl.BlockSpec((n_pad_n, fout_p), lambda i, j, o: (0, 0))
    else:
        h_spec = pl.BlockSpec((block_n, fout_p), lambda i, j, o: (j, 0))
    if adj_buffer_count == 2:
        adj_spec = pl.BlockSpec((block_m, block_n), lambda i, j, o: (i, j))
    else:   # deeper adj pipelining (v5e knob, use if the adj DMA is exposed)
        adj_spec = pl.BlockSpec((block_m, block_n), lambda i, j, o: (i, j),
                                pipeline_mode=pl.Buffered(adj_buffer_count))

    attn = functools.partial(
        _attn_kernel, alpha=alpha, block_n=block_n, n_col_tiles=n_tn,
        h_resident=h_resident,
        approx_recip=(np.dtype(mm_dtype) != np.dtype(jnp.float32)))
    out_p = pl.pallas_call(
        attn,
        out_shape=jax.ShapeDtypeStruct((n_pad_m, fout_p), f32),
        grid_spec=pltpu.PrefetchScalarGridSpec(
            num_scalar_prefetch=1,
            grid=(n_tm, n_tn),
            in_specs=[
                pl.BlockSpec((block_m, 1), lambda i, j, o: (i, 0)),    # f1 rows
                pl.BlockSpec((1, block_n), lambda i, j, o: (0, j)),    # f2^T cols
                adj_spec,                                              # adj int8
                h_spec,                                                # h values
            ],
            out_specs=pl.BlockSpec((block_m, fout_p), lambda i, j, o: (i, 0)),
            scratch_shapes=[pltpu.VMEM((block_m, 1), f32),   # running max
                            pltpu.VMEM((block_m, 1), f32)],  # running sum
        ),
        compiler_params=pltpu.CompilerParams(
            dimension_semantics=("parallel", "arbitrary"),
            vmem_limit_bytes=vmem_p2),
    )(occ_flat, f1, f2t, adj_i8, h)

    return out_p[:N, :Fout].astype(x.dtype)


# ---------------------------------------------------------------------------
# Pure-JAX reference + demo
# ---------------------------------------------------------------------------
def _reference(x, adj, W, a, bias=None, alpha=0.2):
    """Mirrors the PyTorch forward (eval mode).  The concat form
    e[i,j] = [h_i || h_j] @ a decomposes exactly as h_i.a1 + h_j.a2."""
    h = x @ W
    if bias is not None:
        h = h + bias
    Fout = W.shape[1]
    f1 = h @ a[:Fout, :]
    f2 = h @ a[Fout:, :]
    e = f1 + f2.T
    e = jnp.where(e >= 0, e, alpha * e)
    att = jax.nn.softmax(jnp.where(adj > 0, e, _MASK_VALUE), axis=1)
    return jax.nn.elu(att @ h)


def _xavier_uniform(key, shape, dtype=jnp.float32):
    bound = math.sqrt(6.0 / (shape[0] + shape[1]))
    return jax.random.uniform(key, shape, dtype, minval=-bound, maxval=bound)


if __name__ == "__main__":
    def _run_case(N, in_f, out_f, *, mm_dtype, tol, use_bias=False,
                  banded=False, **kw):
        key = jax.random.PRNGKey(0)
        kx, kadj, kw_, ka, kb = jax.random.split(key, 5)
        x = jax.random.normal(kx, (N, in_f), dtype=jnp.float32)
        if banded:
            idx = jnp.arange(N)
            adj = (jnp.abs(idx[:, None] - idx[None, :]) < 16).astype(jnp.float32)
        else:
            adj = (jax.random.uniform(kadj, (N, N)) > 0.5).astype(jnp.float32)
            adj = jnp.maximum(adj, jnp.eye(N, dtype=jnp.float32))  # self-loops
        W = _xavier_uniform(kw_, (in_f, out_f))
        a = _xavier_uniform(ka, (2 * out_f, 1))
        bias = (0.1 * jax.random.normal(kb, (out_f,), jnp.float32)
                if use_bias else None)

        out = attn_graph_convolution(x, adj, W, a, bias=bias, alpha=0.2,
                                     mm_dtype=mm_dtype, **kw)
        out = jax.block_until_ready(out)
        assert out.shape == (N, out_f)

        # Compare against a reference evaluated at the same operand precision.
        xr = x.astype(mm_dtype).astype(jnp.float32)
        Wr = W.astype(mm_dtype).astype(jnp.float32)
        ref = _reference(xr, adj, Wr, a, bias=bias, alpha=0.2)
        err = jnp.max(jnp.abs(out - ref))
        assert jnp.allclose(out, ref, rtol=tol, atol=tol), (
            f"mismatch (N={N}, mm_dtype={mm_dtype}): max_err={err}")

    # 1) Default fast path: bf16 MXU operands, resident h, dense random graph.
    _run_case(200, 24, 40, mm_dtype=jnp.bfloat16, tol=5e-2)
    # 2) Full-precision path with bias (exercises the masked bias add and the
    #    auto-shrunk 2-row-tile "parallel" axis).
    _run_case(200, 24, 40, mm_dtype=jnp.float32, tol=5e-4, use_bias=True)
    # 3) Banded sparse graph: exercises streamed (non-resident) h plus the
    #    occupancy-table skip of empty adjacency tiles.
    _run_case(300, 16, 32, mm_dtype=jnp.float32, tol=5e-4, banded=True,
              block_n=128, h_resident=False)

    print("KERNEL_OK")
</pallas_src>

<mosaic_0001>
module attributes {stable_mosaic.version = 11 : i64} {
  func.func @_proj_kernel(%arg0: i32, %arg1: memref<256x24xbf16, #tpu.memory_space<vmem>>, %arg2: memref<24x128xbf16, #tpu.memory_space<vmem>>, %arg3: memref<1x128xf32, #tpu.memory_space<vmem>>, %arg4: memref<1x128xf32, #tpu.memory_space<vmem>>, %arg5: memref<1x128xf32, #tpu.memory_space<vmem>>, %arg6: memref<256x128xbf16, #tpu.memory_space<vmem>>, %arg7: memref<256x1xf32, #tpu.memory_space<vmem>>, %arg8: memref<256x1xf32, #tpu.memory_space<vmem>>) attributes {dimension_semantics = [#tpu.dimension_semantics<parallel>], iteration_bounds = array<i64: 1>, scalar_prefetch = 0 : i64, scratch_operands = 0 : i64, tpu.core_type = #tpu.core_type<tc>, window_params = [{transform_indices = @transform_0, window_bounds = array<i64: 256, 24>}, {pipeline_mode = #tpu.pipeline_mode<synchronous>, transform_indices = @transform_1, window_bounds = array<i64: 24, 128>}, {pipeline_mode = #tpu.pipeline_mode<synchronous>, transform_indices = @transform_2, window_bounds = array<i64: 1, 128>}, {pipeline_mode = #tpu.pipeline_mode<synchronous>, transform_indices = @transform_3, window_bounds = array<i64: 1, 128>}, {pipeline_mode = #tpu.pipeline_mode<synchronous>, transform_indices = @transform_4, window_bounds = array<i64: 1, 128>}, {transform_indices = @transform_5, window_bounds = array<i64: 256, 128>}, {transform_indices = @transform_6, window_bounds = array<i64: 256, 1>}, {transform_indices = @transform_7, window_bounds = array<i64: 256, 1>}]} {
    %c0 = arith.constant 0 : index
    %c0_0 = arith.constant 0 : index
    %0 = vector.load %arg1[%c0, %c0_0] : memref<256x24xbf16, #tpu.memory_space<vmem>>, vector<256x24xbf16>
    %c0_1 = arith.constant 0 : index
    %c0_2 = arith.constant 0 : index
    %1 = vector.load %arg2[%c0_1, %c0_2] : memref<24x128xbf16, #tpu.memory_space<vmem>>, vector<24x128xbf16>
    %cst = arith.constant dense<0.000000e+00> : vector<256x128xf32>
    %2 = tpu.matmul %0, %1, %cst {dimension_numbers = #tpu.dot_dimension_numbers<[1], [0], [0], [1], [0, 0, 1, 1], [], []>} : vector<256x24xbf16>, vector<24x128xbf16>, vector<256x128xf32> -> vector<256x128xf32>
    %c0_3 = arith.constant 0 : index
    %c0_4 = arith.constant 0 : index
    %3 = vector.load %arg4[%c0_3, %c0_4] : memref<1x128xf32, #tpu.memory_space<vmem>>, vector<1x128xf32>
    %4 = vector.broadcast %3 : vector<1x128xf32> to vector<256x128xf32>
    %5 = arith.mulf %2, %4 : vector<256x128xf32>
    %cst_5 = arith.constant dense<0.000000e+00> : vector<256xf32>
    %6 = vector.multi_reduction <add>, %5, %cst_5 [1] : vector<256x128xf32> to vector<256xf32>
    %7 = vector.shape_cast %6 : vector<256xf32> to vector<256x1xf32>
    %c0_6 = arith.constant 0 : index
    %c0_7 = arith.constant 0 : index
    %8 = vector.load %arg7[%c0_6, %c0_7] : memref<256x1xf32, #tpu.memory_space<vmem>>, vector<256x1xf32>
    tpu.vector_store %arg7[%c0_6, %c0_7], %7 {strides = array<i32>} : memref<256x1xf32, #tpu.memory_space<vmem>>, vector<256x1xf32>,
    %c0_8 = arith.constant 0 : index
    %c0_9 = arith.constant 0 : index
    %9 = vector.load %arg5[%c0_8, %c0_9] : memref<1x128xf32, #tpu.memory_space<vmem>>, vector<1x128xf32>
    %10 = vector.broadcast %9 : vector<1x128xf32> to vector<256x128xf32>
    %11 = arith.mulf %2, %10 : vector<256x128xf32>
    %cst_10 = arith.constant dense<0.000000e+00> : vector<256xf32>
    %12 = vector.multi_reduction <add>, %11, %cst_10 [1] : vector<256x128xf32> to vector<256xf32>
    %13 = vector.shape_cast %12 : vector<256xf32> to vector<256x1xf32>
    %c0_11 = arith.constant 0 : index
    %c0_12 = arith.constant 0 : index
    %14 = vector.load %arg8[%c0_11, %c0_12] : memref<256x1xf32, #tpu.memory_space<vmem>>, vector<256x1xf32>
    tpu.vector_store %arg8[%c0_11, %c0_12], %13 {strides = array<i32>} : memref<256x1xf32, #tpu.memory_space<vmem>>, vector<256x1xf32>,
    %15 = arith.truncf %2 : vector<256x128xf32> to vector<256x128xbf16>
    %c0_13 = arith.constant 0 : index
    %c0_14 = arith.constant 0 : index
    %16 = vector.load %arg6[%c0_13, %c0_14] : memref<256x128xbf16, #tpu.memory_space<vmem>>, vector<256x128xbf16>
    tpu.vector_store %arg6[%c0_13, %c0_14], %15 {strides = array<i32>} : memref<256x128xbf16, #tpu.memory_space<vmem>>, vector<256x128xbf16>,
    return
  }
  func.func @transform_0(%arg0: i32) -> (i32, i32) {
    %c0_i32 = arith.constant 0 : i32
    %c0_i32_0 = arith.constant 0 : i32
    return %arg0, %c0_i32 : i32, i32
  }
  func.func @transform_1(%arg0: i32) -> (i32, i32) {
    %c0_i32 = arith.constant 0 : i32
    %c0_i32_0 = arith.constant 0 : i32
    %c0_i32_1 = arith.constant 0 : i32
    return %c0_i32, %c0_i32_0 : i32, i32
  }
  func.func @transform_2(%arg0: i32) -> (i32, i32) {
    %c0_i32 = arith.constant 0 : i32
    %c0_i32_0 = arith.constant 0 : i32
    %c0_i32_1 = arith.constant 0 : i32
    return %c0_i32, %c0_i32_0 : i32, i32
  }
  func.func @transform_3(%arg0: i32) -> (i32, i32) {
    %c0_i32 = arith.constant 0 : i32
    %c0_i32_0 = arith.constant 0 : i32
    %c0_i32_1 = arith.constant 0 : i32
    return %c0_i32, %c0_i32_0 : i32, i32
  }
  func.func @transform_4(%arg0: i32) -> (i32, i32) {
    %c0_i32 = arith.constant 0 : i32
    %c0_i32_0 = arith.constant 0 : i32
    %c0_i32_1 = arith.constant 0 : i32
    return %c0_i32, %c0_i32_0 : i32, i32
  }
  func.func @transform_5(%arg0: i32) -> (i32, i32) {
    %c0_i32 = arith.constant 0 : i32
    %c0_i32_0 = arith.constant 0 : i32
    return %arg0, %c0_i32 : i32, i32
  }
  func.func @transform_6(%arg0: i32) -> (i32, i32) {
    %c0_i32 = arith.constant 0 : i32
    %c0_i32_0 = arith.constant 0 : i32
    return %arg0, %c0_i32 : i32, i32
  }
  func.func @transform_7(%arg0: i32) -> (i32, i32) {
    %c0_i32 = arith.constant 0 : i32
    %c0_i32_0 = arith.constant 0 : i32
    return %arg0, %c0_i32 : i32, i32
  }
}

</mosaic_0001>

<bundles_post_ra>
// kernel: tpu_custom_call.1
= control target key start
LH: loop header
LB: loop body
LE: loop exit
PB: predicated region body
PF: predicated region fallthrough
CT: control target
= control target key end

     0   :  { %vm198_vm0 = vcmask 1043456   ;;  %vm149_vm1 = vcmask 195584   ;;  %s1724_s0 = inlined_call_operand.vmem [shape: bf16[256,24], index: 0, kind: input, shape index: {}]   ;;  %s1725_s1 = inlined_call_operand.vmem [shape: bf16[24,128], index: 1, kind: input, shape index: {}]   ;;  %s1726_s2 = inlined_call_operand.vmem [shape: f32[1,128], index: 2, kind: input, shape index: {}]   ;;  %s1727_s3 = inlined_call_operand.vmem [shape: f32[1,128], index: 3, kind: input, shape index: {}]   ;;  %s1728_s4 = inlined_call_operand.vmem [shape: f32[1,128], index: 4, kind: input, shape index: {}]   ;;  %s1729_s5 = inlined_call_operand.hbm [shape: bf16[256,128], index: 5, kind: output, shape index: {0}]   ;;  %s1730_s6 = inlined_call_operand.vmem [shape: f32[256,1], index: 6, kind: output, shape index: {1}]   ;;  %s1731_s7 = inlined_call_operand.vmem [shape: f32[256,1], index: 7, kind: output, shape index: {2}]  }
   0x1   :  { %v1076_v0 = vld [vmem:[%s1725_s1] sm:$0xff]   ;;  %v1077_v1 = vld [vmem:[%s1725_s1 + $0x8] ss:$0 sps:$4 sm:$0xff]   ;;  %v1082_v7 = vld [vmem:[%s1724_s0 + $0x10] sm:$0xff]  }
   0x2   :  { %1031 = vmatprep.subr.bf16.mxu0 %v1076_v0  ;;  %1067 = vmatprep.subr.bf16.mxu1 %v1076_v0  ;;  %v1078_v2 = vld [vmem:[%s1724_s0] sm:$0xff]   ;;  %v200_v4 = vsel %vm198_vm0, %v1077_v1, 0  ;;  %v1080_v5 = vld [vmem:[%s1724_s0 + $0x8] sm:$0xff]   ;;  %v1084_v8 = vld [vmem:[%s1724_s0 + $0x50] sm:$0xff]  }
   0x3   :  { %1032 = vmatpush3.bf16.msra.mxu0 %v1076_v0  ;;  %1069 = vmatpush3.bf16.msra.mxu1 %v1076_v0  ;;  %v1079_v3 = vld [vmem:[%s1724_s0 + $0x40] sm:$0xff]   ;;  %v1081_v6 = vld [vmem:[%s1724_s0 + $0x48] sm:$0xff]   ;;  %v1083_v9 = vld [vmem:[%s1724_s0 + $0x18] sm:$0xff]  }
   0x4   :  { %1071 = vmatprep.subr.msk.bf16.mxu0 %vm198_vm0, %v1077_v1  ;;  %1072 = vmatprep.subr.msk.bf16.mxu1 %vm198_vm0, %v1077_v1  ;;  %v1085_v10 = vld [vmem:[%s1724_s0 + $0x58] sm:$0xff]   ;;  %v1086_v11 = vld [vmem:[%s1724_s0 + $0x20] sm:$0xff]  }
   0x5   :  { %1035 = vmatprep.mubr.msk.bf16.mxu0 %vm149_vm1, %v1078_v2  ;;  %1051 = vmatprep.mubr.msk.bf16.mxu1 %vm149_vm1, %v1079_v3  ;;  %v1088_v12 = vld [vmem:[%s1724_s0 + $0x60] sm:$0xff]  }
   0x7   :  { %1034 = vmatpush3.bf16.msra.mxu0 %v200_v4  ;;  %1070 = vmatpush3.bf16.msra.mxu1 %v200_v4 }
   0xa   :  { %1036 = vmatmul.mubr.msk.bf16.vlgmr.msra.gmra.mrb[0].mxu0 %vm149_vm1, %v1080_v5  ;;  %1052 = vmatmul.mubr.msk.bf16.vlgmr.msra.gmra.mrb[0].mxu1 %vm149_vm1, %v1081_v6 }
   0xb   :  { %1039 = vmatprep.mubr.msk.bf16.mxu0 %vm149_vm1, %v1082_v7  ;;  %1055 = vmatprep.mubr.msk.bf16.mxu1 %vm149_vm1, %v1084_v8 }
   0xc   :  { %13 = vsyncpa [#allocation3], 0  ;;  %v1087_v13 = vld [vmem:[%s1724_s0 + $0x28] sm:$0xff]   ;;  %v1090_v15 = vld [vmem:[%s1724_s0 + $0x30] sm:$0xff]   ;;  %vm466_vm2 = vcmask 7168  }
   0xd   :  { %v1089_v14 = vld [vmem:[%s1724_s0 + $0x68] sm:$0xff]   ;;  %v1092_v16 = vld [vmem:[%s1724_s0 + $0x70] sm:$0xff]   ;;  %v1091_v17 = vld [vmem:[%s1724_s0 + $0x38] sm:$0xff]  }
   0xe   :  { %v1093_v18 = vld [vmem:[%s1724_s0 + $0x78] sm:$0xff]   ;;  %v1234_v19 = vld [vmem:[%s1727_s3] ss:$0 sm:$0xff]  ;;  %s1118_s3 = smov [#allocation2]  }
   0xf   :  { %v1243_v28 = vld [vmem:[%s1728_s4] ss:$0 sm:$0xff]  ;;  %s799_s4 = sshll.u32 %s1118_s3, 4  ;;  %s800_s4 = int_to_ptr.vmem [resolvable:$true] %s799_s4 }
  0x10   :  { %s1094_s13 = scalar_lea.vmem %s800_s4, 2048  ;;  %p1099_p1 = scmp.lt.s32.totalorder %s800_s4, %s800_s4 }
  0x11   :  { %p1095_p0 = scmp.ne.s32.totalorder %s800_s4, %s1094_s13  ;;  %p1100_p2 = scmp.lt.s32.totalorder %s1094_s13, %s1094_s13 }
  0x12   :  { %1040 = vmatmul.mubr.msk.bf16.gmra.mrb[4].mxu0 %vm149_vm1, %v1083_v9  ;;  %1056 = vmatmul.mubr.msk.bf16.gmra.mrb[4].mxu1 %vm149_vm1, %v1085_v10 }
  0x13   :  { %1043 = vmatprep.mubr.msk.bf16.mxu0 %vm149_vm1, %v1086_v11  ;;  %1059 = vmatprep.mubr.msk.bf16.mxu1 %vm149_vm1, %v1088_v12  ;;  %p1101_p3 = por %p1100_p2, %p1099_p1 }
  0x15   :  { %p1102_p4 = pnand %p1101_p3, %p1095_p0 }
  0x1a   :  { %1044 = vmatmul.mubr.msk.bf16.gmra.mrb[8].mxu0 %vm149_vm1, %v1087_v13  ;;  %1060 = vmatmul.mubr.msk.bf16.gmra.mrb[8].mxu1 %vm149_vm1, %v1089_v14 }
  0x1b   :  { %1047 = vmatprep.mubr.msk.bf16.mxu0 %vm149_vm1, %v1090_v15  ;;  %1063 = vmatprep.mubr.msk.bf16.mxu1 %vm149_vm1, %v1092_v16 }
  0x22   :  { %1048 = vmatmul.mubr.msk.bf16.gmra.mrb[12].mxu0 %vm149_vm1, %v1091_v17  ;;  %1064 = vmatmul.mubr.msk.bf16.gmra.mrb[12].mxu1 %vm149_vm1, %v1093_v18 }
  0xdd   :  { %v1037_v20 = vpop.f32.mrb[0].mxu0  ;;  %v1053_v21 = vpop.f32.mrb[0].mxu1 }
  0xde   :  { %v236_v22 = vpop.f32.mrb[1].mxu0  ;;  %v1236_v23 = vpop.f32.mrb[1].mxu1  ;;  %v388_v24 = vmul.f32 %v1053_v21, %v1234_v19  ;;  %v372_v25 = vmul.f32 %v1037_v20, %v1234_v19  ;;  %v508_v35 = vmul.f32 %v1037_v20, %v1243_v28  ;;  %v524_v39 = vmul.f32 %v1053_v21, %v1243_v28 }
  0xdf   :  { %v1038_v26 = vpop.f32.mrb[2].mxu0  ;;  %v1054_v27 = vpop.f32.mrb[2].mxu1  ;;  %v370_v51 = vmul.f32 %v1234_v19, %v236_v22  ;;  %v386_v53 = vmul.f32 %v1234_v19, %v1236_v23  ;;  %v506_v55 = vmul.f32 %v1243_v28, %v236_v22 }
  0xe0   :  { %v926_v29 = vpack.c.bf16 %v1038_v26, %v1037_v20  ;;  %v966_v30 = vpack.c.bf16 %v1054_v27, %v1053_v21  ;;  %438 = vadd.xlane.f32.xlu0 %v388_v24  ;;  %v1245_v31 = vpop.f32.mrb[3].mxu1  ;;  %406 = vadd.xlane.f32.xlu1 %v372_v25  ;;  %v1247_v32 = vpop.f32.mrb[3].mxu0  ;;  %v373_v36 = vmul.f32 %v1038_v26, %v1234_v19 }
  0xe1   :  { %v961_v33 = vpack.c.bf16 %v1245_v31, %v1236_v23  ;;  %v921_v34 = vpack.c.bf16 %v1247_v32, %v236_v22  ;;  %v389_v40 = vmul.f32 %v1054_v27, %v1234_v19  ;;  %v509_v52 = vmul.f32 %v1038_v26, %v1243_v28 }
  0xe2   :  { %998 = vst [vmem:[#allocation2 + $0x8] sm:$0xff] %v926_v29   ;;  %1006 = vst [vmem:[#allocation2 + $0x48] sm:$0xff] %v966_v30   ;;  %v525_v54 = vmul.f32 %v1054_v27, %v1243_v28  ;;  %v387_v56 = vmul.f32 %v1234_v19, %v1245_v31  ;;  %v522_v22 = vmul.f32 %v1243_v28, %v1236_v23 }
  0xe3   :  { %1005 = vst [vmem:[#allocation2 + $0x40] sm:$0xff] %v961_v33   ;;  %922 = vst [vmem:[#allocation2] sm:$0xff] %v921_v34   ;;  %v507_v24 = vmul.f32 %v1243_v28, %v1247_v32  ;;  %v523_v25 = vmul.f32 %v1243_v28, %v1245_v31  ;;  %v371_v26 = vmul.f32 %v1234_v19, %v1247_v32 }
  0xe4   :  { %542 = vadd.xlane.f32.xlu0 %v508_v35  ;;  %408 = vadd.xlane.f32.xlu1 %v373_v36 }
  0xe5   :  { %v1254_v37 = vpop.f32.mrb[4].mxu0  ;;  %v1256_v38 = vpop.f32.mrb[4].mxu1 }
  0xe6   :  { %v1260_v41 = vpop.f32.mrb[5].mxu0  ;;  %v1262_v42 = vpop.f32.mrb[5].mxu1 }
  0xe7   :  { %v1264_v43 = vpop.f32.mrb[6].mxu0  ;;  %v1266_v44 = vpop.f32.mrb[6].mxu1 }
  0xe8   :  { %574 = vadd.xlane.f32.xlu0 %v524_v39  ;;  %440 = vadd.xlane.f32.xlu1 %v389_v40  ;;  %v936_v45 = vpack.c.bf16 %v1264_v43, %v1254_v37  ;;  %v1270_v46 = vpop.f32.mrb[7].mxu0  ;;  %v976_v47 = vpack.c.bf16 %v1266_v44, %v1256_v38  ;;  %v1274_v48 = vpop.f32.mrb[7].mxu1 }
  0xe9   :  { %v931_v49 = vpack.c.bf16 %v1270_v46, %v1260_v41  ;;  %v971_v50 = vpack.c.bf16 %v1274_v48, %v1262_v42 }
  0xea   :  { %1000 = vst [vmem:[#allocation2 + $0x18] sm:$0xff] %v936_v45   ;;  %1008 = vst [vmem:[#allocation2 + $0x58] sm:$0xff] %v976_v47  }
  0xeb   :  { %999 = vst [vmem:[#allocation2 + $0x10] sm:$0xff] %v931_v49   ;;  %1007 = vst [vmem:[#allocation2 + $0x50] sm:$0xff] %v971_v50  }
  0xec   :  { %402 = vadd.xlane.f32.xlu0 %v370_v51  ;;  %544 = vadd.xlane.f32.xlu1 %v509_v52 }
  0xed   :  { %v1045_v57 = vpop.f32.mrb[8].mxu0  ;;  %v1061_v58 = vpop.f32.mrb[8].mxu1 }
  0xee   :  { %v268_v59 = vpop.f32.mrb[9].mxu0  ;;  %v332_v60 = vpop.f32.mrb[9].mxu1  ;;  %v1289_v61 = vmul.f32 %v1045_v57, %v1234_v19  ;;  %v1292_v62 = vmul.f32 %v1061_v58, %v1234_v19  ;;  %v1295_v63 = vmul.f32 %v1045_v57, %v1243_v28  ;;  %v1298_v0 = vmul.f32 %v1061_v58, %v1243_v28 }
  0xef   :  { %v1046_v1 = vpop.f32.mrb[10].mxu0  ;;  %v1062_v2 = vpop.f32.mrb[10].mxu1  ;;  %v1301_v3 = vmul.f32 %v1234_v19, %v268_v59  ;;  %v1304_v4 = vmul.f32 %v1234_v19, %v332_v60  ;;  %v1307_v5 = vmul.f32 %v1243_v28, %v268_v59  ;;  %v1310_v6 = vmul.f32 %v1243_v28, %v332_v60 }
  0xf0   :  { %434 = vadd.xlane.f32.xlu0 %v386_v53  ;;  %576 = vadd.xlane.f32.xlu1 %v525_v54  ;;  %v946_v7 = vpack.c.bf16 %v1046_v1, %v1045_v57  ;;  %v271_v8 = vpop.f32.mrb[11].mxu0  ;;  %v986_v9 = vpack.c.bf16 %v1062_v2, %v1061_v58  ;;  %v335_v10 = vpop.f32.mrb[11].mxu1  ;;  %v1313_v11 = vmul.f32 %v1046_v1, %v1234_v19 }
  0xf1   :  { %v941_v12 = vpack.c.bf16 %v271_v8, %v268_v59  ;;  %v981_v13 = vpack.c.bf16 %v335_v10, %v332_v60  ;;  %v1316_v14 = vmul.f32 %v1062_v2, %v1234_v19  ;;  %v1319_v15 = vmul.f32 %v1046_v1, %v1243_v28 }
  0xf2   :  { %1002 = vst [vmem:[#allocation2 + $0x28] sm:$0xff] %v946_v7   ;;  %1010 = vst [vmem:[#allocation2 + $0x68] sm:$0xff] %v986_v9   ;;  %v1322_v16 = vmul.f32 %v1062_v2, %v1243_v28  ;;  %v1325_v17 = vmul.f32 %v1234_v19, %v271_v8  ;;  %v1328_v18 = vmul.f32 %v1234_v19, %v335_v10 }
  0xf3   :  { %v1331_v20 = vmul.f32 %v1243_v28, %v271_v8  ;;  %1001 = vst [vmem:[#allocation2 + $0x20] sm:$0xff] %v941_v12   ;;  %1009 = vst [vmem:[#allocation2 + $0x60] sm:$0xff] %v981_v13   ;;  %v1334_v21 = vmul.f32 %v1243_v28, %v335_v10  ;;  %v376_v7 = vmul.f32 %v1254_v37, %v1234_v19 }
  0xf4   :  { %538 = vadd.xlane.f32.xlu0 %v506_v55  ;;  %436 = vadd.xlane.f32.xlu1 %v387_v56  ;;  %v377_v8 = vmul.f32 %v1264_v43, %v1234_v19  ;;  %v392_v9 = vmul.f32 %v1256_v38, %v1234_v19  ;;  %v393_v10 = vmul.f32 %v1266_v44, %v1234_v19 }
  0xf5   :  { %v1049_v27 = vpop.f32.mrb[12].mxu0  ;;  %v1065_v29 = vpop.f32.mrb[12].mxu1  ;;  %v512_v12 = vmul.f32 %v1254_v37, %v1243_v28  ;;  %v513_v13 = vmul.f32 %v1264_v43, %v1243_v28  ;;  %v390_v37 = vmul.f32 %v1234_v19, %v1262_v42  ;;  %v391_v43 = vmul.f32 %v1234_v19, %v1274_v48 }
  0xf6   :  { %v284_v30 = vpop.f32.mrb[13].mxu0  ;;  %v348_v33 = vpop.f32.mrb[13].mxu1  ;;  %v1345_v34 = vmul.f32 %v1049_v27, %v1234_v19  ;;  %v1348_v35 = vmul.f32 %v1065_v29, %v1234_v19  ;;  %v1351_v23 = vmul.f32 %v1049_v27, %v1243_v28  ;;  %v1354_v36 = vmul.f32 %v1065_v29, %v1243_v28 }
  0xf7   :  { %v1050_v31 = vpop.f32.mrb[14].mxu0  ;;  %v1066_v39 = vpop.f32.mrb[14].mxu1  ;;  %v1357_v32 = vmul.f32 %v1234_v19, %v284_v30  ;;  %v1360_v40 = vmul.f32 %v1234_v19, %v348_v33  ;;  %v1363_v45 = vmul.f32 %v1243_v28, %v284_v30  ;;  %v1366_v47 = vmul.f32 %v1243_v28, %v348_v33 }
  0xf8   :  { %570 = vadd.xlane.f32.xlu0 %v522_v22  ;;  %540 = vadd.xlane.f32.xlu1 %v507_v24  ;;  %v956_v49 = vpack.c.bf16 %v1050_v31, %v1049_v27  ;;  %v287_v50 = vpop.f32.mrb[15].mxu0  ;;  %v996_v51 = vpack.c.bf16 %v1066_v39, %v1065_v29  ;;  %v351_v52 = vpop.f32.mrb[15].mxu1  ;;  %v1369_v53 = vmul.f32 %v1050_v31, %v1234_v19 }
  0xf9   :  { %v951_v54 = vpack.c.bf16 %v287_v50, %v284_v30  ;;  %v991_v55 = vpack.c.bf16 %v351_v52, %v348_v33  ;;  %v1372_v56 = vmul.f32 %v1066_v39, %v1234_v19  ;;  %v1375_v57 = vmul.f32 %v1050_v31, %v1243_v28 }
  0xfa   :  { %1004 = vst [vmem:[#allocation2 + $0x38] sm:$0xff] %v956_v49   ;;  %1012 = vst [vmem:[#allocation2 + $0x78] sm:$0xff] %v996_v51   ;;  %v1378_v58 = vmul.f32 %v1234_v19, %v287_v50  ;;  %v1381_v59 = vmul.f32 %v1234_v19, %v351_v52  ;;  %v1384_v60 = vmul.f32 %v1243_v28, %v287_v50 }
  0xfb   :  { %v1387_v1 = vmul.f32 %v1243_v28, %v351_v52  ;;  %1003 = vst [vmem:[#allocation2 + $0x30] sm:$0xff] %v951_v54   ;;  %1011 = vst [vmem:[#allocation2 + $0x70] sm:$0xff] %v991_v55   ;;  %v1390_v2 = vmul.f32 %v1066_v39, %v1243_v28  ;;  %v528_v22 = vmul.f32 %v1256_v38, %v1243_v28 }
  0xfc   :  { %572 = vadd.xlane.f32.xlu1 %v523_v25  ;;  %404 = vadd.xlane.f32.xlu0 %v371_v26  ;;  %v529_v24 = vmul.f32 %v1266_v44, %v1243_v28  ;;  %v374_v25 = vmul.f32 %v1234_v19, %v1260_v41  ;;  %v375_v26 = vmul.f32 %v1234_v19, %v1270_v46 }
  0xfd   :  { %v510_v38 = vmul.f32 %v1243_v28, %v1260_v41  ;;  %v511_v44 = vmul.f32 %v1243_v28, %v1270_v46  ;;  %v526_v27 = vmul.f32 %v1243_v28, %v1262_v42  ;;  %v527_v29 = vmul.f32 %v1243_v28, %v1274_v48 }
 0x100   :  { %414 = vadd.xlane.f32.xlu0 %v376_v7  ;;  %416 = vadd.xlane.f32.xlu1 %v377_v8 }
 0x104   :  { %446 = vadd.xlane.f32.xlu0 %v392_v9  ;;  %448 = vadd.xlane.f32.xlu1 %v393_v10 }
 0x108   :  { %550 = vadd.xlane.f32.xlu0 %v512_v12  ;;  %552 = vadd.xlane.f32.xlu1 %v513_v13 }
 0x10c   :  { %582 = vadd.xlane.f32.xlu0 %v528_v22  ;;  %584 = vadd.xlane.f32.xlu1 %v529_v24 }
 0x110   :  { %410 = vadd.xlane.f32.xlu0 %v374_v25  ;;  %412 = vadd.xlane.f32.xlu1 %v375_v26 }
 0x114   :  { %442 = vadd.xlane.f32.xlu0 %v390_v37  ;;  %444 = vadd.xlane.f32.xlu1 %v391_v43 }
 0x118   :  { %546 = vadd.xlane.f32.xlu0 %v510_v38  ;;  %548 = vadd.xlane.f32.xlu1 %v511_v44 }
 0x11c   :  { %578 = vadd.xlane.f32.xlu0 %v526_v27  ;;  %580 = vadd.xlane.f32.xlu1 %v527_v29 }
 0x120   :  { %422 = vadd.xlane.f32.xlu0 %v1289_v61  ;;  %424 = vadd.xlane.f32.xlu1 %v1313_v11 }
 0x124   :  { %454 = vadd.xlane.f32.xlu0 %v1292_v62  ;;  %456 = vadd.xlane.f32.xlu1 %v1316_v14 }
 0x128   :  { %558 = vadd.xlane.f32.xlu0 %v1295_v63  ;;  %560 = vadd.xlane.f32.xlu1 %v1319_v15 }
 0x12c   :  { %590 = vadd.xlane.f32.xlu0 %v1298_v0  ;;  %592 = vadd.xlane.f32.xlu1 %v1322_v16 }
 0x130   :  { %418 = vadd.xlane.f32.xlu0 %v1301_v3  ;;  %420 = vadd.xlane.f32.xlu1 %v1325_v17 }
 0x134   :  { %450 = vadd.xlane.f32.xlu0 %v1304_v4  ;;  %452 = vadd.xlane.f32.xlu1 %v1328_v18 }
 0x138   :  { %554 = vadd.xlane.f32.xlu0 %v1307_v5  ;;  %556 = vadd.xlane.f32.xlu1 %v1331_v20 }
 0x13c   :  { %586 = vadd.xlane.f32.xlu0 %v1310_v6  ;;  %588 = vadd.xlane.f32.xlu1 %v1334_v21 }
 0x140   :  { %430 = vadd.xlane.f32.xlu0 %v1345_v34  ;;  %432 = vadd.xlane.f32.xlu1 %v1369_v53 }
 0x144   :  { %462 = vadd.xlane.f32.xlu0 %v1348_v35  ;;  %464 = vadd.xlane.f32.xlu1 %v1372_v56 }
 0x148   :  { %566 = vadd.xlane.f32.xlu0 %v1351_v23  ;;  %568 = vadd.xlane.f32.xlu1 %v1375_v57 }
 0x14c   :  { %426 = vadd.xlane.f32.xlu0 %v1357_v32  ;;  %428 = vadd.xlane.f32.xlu1 %v1378_v58 }
 0x150   :  { %458 = vadd.xlane.f32.xlu0 %v1360_v40  ;;  %460 = vadd.xlane.f32.xlu1 %v1381_v59 }
 0x154   :  { %562 = vadd.xlane.f32.xlu0 %v1363_v45  ;;  %564 = vadd.xlane.f32.xlu1 %v1384_v60 }
 0x158   :  { %594 = vadd.xlane.f32.xlu0 %v1366_v47  ;;  %596 = vadd.xlane.f32.xlu1 %v1387_v1 }
 0x15c   :  { %598 = vadd.xlane.f32.xlu0 %v1354_v36  ;;  %600 = vadd.xlane.f32.xlu1 %v1390_v2 }
 0x15d   :  { %1105 = shalt.err (!%p1102_p4)
}
 0x15e   :  { %s1106_s16 = scalar_lea.hbm %s1729_s5, 2048 }
 0x15f   :  { %p1107_p5 = scmp.ne.s32.totalorder %s1729_s5, %s1106_s16  ;;  %p1110_p6 = scmp.lt.u32.totalorder %s1106_s16, %s1729_s5 }
 0x161   :  { %p1112_p7 = pnand %p1110_p6, %p1107_p5 }
 0x163   :  { %1115 = shalt.err (!%p1112_p7)
}
 0x164   :  { %s1119_s21 = smov 64   ;;  %s1120_s22 = smov 4  }
 0x165   :  { %805 = dma.vmem_to_hbm [thread:$0]  %s800_s4, 2048, %s1729_s5, [#allocation3], %s1119_s21, %s1119_s21, %s1120_s22  }
 0x16d   :  { %v439_v19 = vpop.xlane.xlu0 %438  ;;  %v407_v28 = vpop.xlane.xlu1 %406 }
 0x16e   :  { %485 = vst.msk [vmem:[%s1730_s6 + $0x90] sm:$0xff] %vm466_vm2, %v439_v19  ;;  %469 = vst.msk [vmem:[%s1730_s6 + $0x10] sm:$0xff] %vm466_vm2, %v407_v28 }
 0x171   :  { %v543_v41 = vpop.xlane.xlu0 %542  ;;  %v409_v42 = vpop.xlane.xlu1 %408 }
 0x172   :  { %604 = vst.msk [vmem:[%s1731_s7 + $0x10] sm:$0xff] %vm466_vm2, %v543_v41  ;;  %470 = vst.msk [vmem:[%s1730_s6 + $0x18] sm:$0xff] %vm466_vm2, %v409_v42 }
 0x175   :  { %v575_v46 = vpop.xlane.xlu0 %574  ;;  %v441_v48 = vpop.xlane.xlu1 %440 }
 0x176   :  { %620 = vst.msk [vmem:[%s1731_s7 + $0x90] sm:$0xff] %vm466_vm2, %v575_v46  ;;  %486 = vst.msk [vmem:[%s1730_s6 + $0x98] sm:$0xff] %vm466_vm2, %v441_v48 }
 0x179   :  { %v403_v61 = vpop.xlane.xlu0 %402  ;;  %v545_v62 = vpop.xlane.xlu1 %544 }
 0x17a   :  { %467 = vst.msk [vmem:[%s1730_s6] sm:$0xff] %vm466_vm2, %v403_v61  ;;  %605 = vst.msk [vmem:[%s1731_s7 + $0x18] sm:$0xff] %vm466_vm2, %v545_v62 }
 0x17d   :  { %v435_v63 = vpop.xlane.xlu0 %434  ;;  %v577_v0 = vpop.xlane.xlu1 %576 }
 0x17e   :  { %483 = vst.msk [vmem:[%s1730_s6 + $0x80] sm:$0xff] %vm466_vm2, %v435_v63  ;;  %621 = vst.msk [vmem:[%s1731_s7 + $0x98] sm:$0xff] %vm466_vm2, %v577_v0 }
 0x181   :  { %v539_v3 = vpop.xlane.xlu0 %538  ;;  %v437_v4 = vpop.xlane.xlu1 %436 }
 0x182   :  { %602 = vst.msk [vmem:[%s1731_s7] sm:$0xff] %vm466_vm2, %v539_v3  ;;  %484 = vst.msk [vmem:[%s1730_s6 + $0x88] sm:$0xff] %vm466_vm2, %v437_v4 }
 0x185   :  { %v571_v5 = vpop.xlane.xlu0 %570  ;;  %v541_v6 = vpop.xlane.xlu1 %540 }
 0x186   :  { %618 = vst.msk [vmem:[%s1731_s7 + $0x80] sm:$0xff] %vm466_vm2, %v571_v5  ;;  %603 = vst.msk [vmem:[%s1731_s7 + $0x8] sm:$0xff] %vm466_vm2, %v541_v6 }
 0x189   :  { %v573_v11 = vpop.xlane.xlu1 %572  ;;  %v405_v14 = vpop.xlane.xlu0 %404 }
 0x18a   :  { %619 = vst.msk [vmem:[%s1731_s7 + $0x88] sm:$0xff] %vm466_vm2, %v573_v11  ;;  %468 = vst.msk [vmem:[%s1730_s6 + $0x8] sm:$0xff] %vm466_vm2, %v405_v14 }
 0x18d   :  { %v415_v15 = vpop.xlane.xlu0 %414  ;;  %v417_v16 = vpop.xlane.xlu1 %416 }
 0x18e   :  { %473 = vst.msk [vmem:[%s1730_s6 + $0x30] sm:$0xff] %vm466_vm2, %v415_v15  ;;  %474 = vst.msk [vmem:[%s1730_s6 + $0x38] sm:$0xff] %vm466_vm2, %v417_v16 }
 0x191   :  { %v447_v17 = vpop.xlane.xlu0 %446  ;;  %v449_v18 = vpop.xlane.xlu1 %448 }
 0x192   :  { %489 = vst.msk [vmem:[%s1730_s6 + $0xb0] sm:$0xff] %vm466_vm2, %v447_v17  ;;  %490 = vst.msk [vmem:[%s1730_s6 + $0xb8] sm:$0xff] %vm466_vm2, %v449_v18 }
 0x195   :  { %v551_v20 = vpop.xlane.xlu0 %550  ;;  %v553_v21 = vpop.xlane.xlu1 %552 }
 0x196   :  { %608 = vst.msk [vmem:[%s1731_s7 + $0x30] sm:$0xff] %vm466_vm2, %v551_v20  ;;  %609 = vst.msk [vmem:[%s1731_s7 + $0x38] sm:$0xff] %vm466_vm2, %v553_v21 }
 0x199   :  { %v583_v30 = vpop.xlane.xlu0 %582  ;;  %v585_v33 = vpop.xlane.xlu1 %584 }
 0x19a   :  { %624 = vst.msk [vmem:[%s1731_s7 + $0xb0] sm:$0xff] %vm466_vm2, %v583_v30  ;;  %625 = vst.msk [vmem:[%s1731_s7 + $0xb8] sm:$0xff] %vm466_vm2, %v585_v33 }
 0x19d   :  { %v411_v34 = vpop.xlane.xlu0 %410  ;;  %v413_v35 = vpop.xlane.xlu1 %412 }
 0x19e   :  { %471 = vst.msk [vmem:[%s1730_s6 + $0x20] sm:$0xff] %vm466_vm2, %v411_v34  ;;  %472 = vst.msk [vmem:[%s1730_s6 + $0x28] sm:$0xff] %vm466_vm2, %v413_v35 }
 0x1a1   :  { %v443_v23 = vpop.xlane.xlu0 %442  ;;  %v445_v36 = vpop.xlane.xlu1 %444 }
 0x1a2   :  { %487 = vst.msk [vmem:[%s1730_s6 + $0xa0] sm:$0xff] %vm466_vm2, %v443_v23  ;;  %488 = vst.msk [vmem:[%s1730_s6 + $0xa8] sm:$0xff] %vm466_vm2, %v445_v36 }
 0x1a5   :  { %v547_v31 = vpop.xlane.xlu0 %546  ;;  %v549_v39 = vpop.xlane.xlu1 %548 }
 0x1a6   :  { %606 = vst.msk [vmem:[%s1731_s7 + $0x20] sm:$0xff] %vm466_vm2, %v547_v31  ;;  %607 = vst.msk [vmem:[%s1731_s7 + $0x28] sm:$0xff] %vm466_vm2, %v549_v39 }
 0x1a9   :  { %v579_v32 = vpop.xlane.xlu0 %578  ;;  %v581_v40 = vpop.xlane.xlu1 %580 }
 0x1aa   :  { %622 = vst.msk [vmem:[%s1731_s7 + $0xa0] sm:$0xff] %vm466_vm2, %v579_v32  ;;  %623 = vst.msk [vmem:[%s1731_s7 + $0xa8] sm:$0xff] %vm466_vm2, %v581_v40 }
 0x1ad   :  { %v423_v45 = vpop.xlane.xlu0 %422  ;;  %v425_v47 = vpop.xlane.xlu1 %424 }
 0x1ae   :  { %477 = vst.msk [vmem:[%s1730_s6 + $0x50] sm:$0xff] %vm466_vm2, %v423_v45  ;;  %478 = vst.msk [vmem:[%s1730_s6 + $0x58] sm:$0xff] %vm466_vm2, %v425_v47 }
 0x1b1   :  { %v455_v49 = vpop.xlane.xlu0 %454  ;;  %v457_v50 = vpop.xlane.xlu1 %456 }
 0x1b2   :  { %493 = vst.msk [vmem:[%s1730_s6 + $0xd0] sm:$0xff] %vm466_vm2, %v455_v49  ;;  %494 = vst.msk [vmem:[%s1730_s6 + $0xd8] sm:$0xff] %vm466_vm2, %v457_v50 }
 0x1b5   :  { %v559_v51 = vpop.xlane.xlu0 %558  ;;  %v561_v52 = vpop.xlane.xlu1 %560 }
 0x1b6   :  { %612 = vst.msk [vmem:[%s1731_s7 + $0x50] sm:$0xff] %vm466_vm2, %v559_v51  ;;  %613 = vst.msk [vmem:[%s1731_s7 + $0x58] sm:$0xff] %vm466_vm2, %v561_v52 }
 0x1b9   :  { %v591_v53 = vpop.xlane.xlu0 %590  ;;  %v593_v54 = vpop.xlane.xlu1 %592 }
 0x1ba   :  { %628 = vst.msk [vmem:[%s1731_s7 + $0xd0] sm:$0xff] %vm466_vm2, %v591_v53  ;;  %629 = vst.msk [vmem:[%s1731_s7 + $0xd8] sm:$0xff] %vm466_vm2, %v593_v54 }
 0x1bd   :  { %v419_v55 = vpop.xlane.xlu0 %418  ;;  %v421_v56 = vpop.xlane.xlu1 %420 }
 0x1be   :  { %475 = vst.msk [vmem:[%s1730_s6 + $0x40] sm:$0xff] %vm466_vm2, %v419_v55  ;;  %476 = vst.msk [vmem:[%s1730_s6 + $0x48] sm:$0xff] %vm466_vm2, %v421_v56 }
 0x1c1   :  { %v451_v57 = vpop.xlane.xlu0 %450  ;;  %v453_v58 = vpop.xlane.xlu1 %452 }
 0x1c2   :  { %491 = vst.msk [vmem:[%s1730_s6 + $0xc0] sm:$0xff] %vm466_vm2, %v451_v57  ;;  %492 = vst.msk [vmem:[%s1730_s6 + $0xc8] sm:$0xff] %vm466_vm2, %v453_v58 }
 0x1c5   :  { %v555_v59 = vpop.xlane.xlu0 %554  ;;  %v557_v60 = vpop.xlane.xlu1 %556 }
 0x1c6   :  { %610 = vst.msk [vmem:[%s1731_s7 + $0x40] sm:$0xff] %vm466_vm2, %v555_v59  ;;  %611 = vst.msk [vmem:[%s1731_s7 + $0x48] sm:$0xff] %vm466_vm2, %v557_v60 }
 0x1c9   :  { %v587_v1 = vpop.xlane.xlu0 %586  ;;  %v589_v2 = vpop.xlane.xlu1 %588 }
 0x1ca   :  { %626 = vst.msk [vmem:[%s1731_s7 + $0xc0] sm:$0xff] %vm466_vm2, %v587_v1  ;;  %627 = vst.msk [vmem:[%s1731_s7 + $0xc8] sm:$0xff] %vm466_vm2, %v589_v2 }
 0x1cd   :  { %v431_v7 = vpop.xlane.xlu0 %430  ;;  %v433_v8 = vpop.xlane.xlu1 %432 }
 0x1ce   :  { %481 = vst.msk [vmem:[%s1730_s6 + $0x70] sm:$0xff] %vm466_vm2, %v431_v7  ;;  %482 = vst.msk [vmem:[%s1730_s6 + $0x78] sm:$0xff] %vm466_vm2, %v433_v8 }
 0x1d1   :  { %v463_v9 = vpop.xlane.xlu0 %462  ;;  %v465_v10 = vpop.xlane.xlu1 %464 }
 0x1d2   :  { %497 = vst.msk [vmem:[%s1730_s6 + $0xf0] sm:$0xff] %vm466_vm2, %v463_v9  ;;  %498 = vst.msk [vmem:[%s1730_s6 + $0xf8] sm:$0xff] %vm466_vm2, %v465_v10 }
 0x1d5   :  { %v567_v12 = vpop.xlane.xlu0 %566  ;;  %v569_v13 = vpop.xlane.xlu1 %568 }
 0x1d6   :  { %616 = vst.msk [vmem:[%s1731_s7 + $0x70] sm:$0xff] %vm466_vm2, %v567_v12  ;;  %617 = vst.msk [vmem:[%s1731_s7 + $0x78] sm:$0xff] %vm466_vm2, %v569_v13 }
 0x1d9   :  { %v427_v22 = vpop.xlane.xlu0 %426  ;;  %v429_v24 = vpop.xlane.xlu1 %428 }
 0x1da   :  { %479 = vst.msk [vmem:[%s1730_s6 + $0x60] sm:$0xff] %vm466_vm2, %v427_v22  ;;  %480 = vst.msk [vmem:[%s1730_s6 + $0x68] sm:$0xff] %vm466_vm2, %v429_v24 }
 0x1dd   :  { %v459_v25 = vpop.xlane.xlu0 %458  ;;  %v461_v26 = vpop.xlane.xlu1 %460 }
 0x1de   :  { %495 = vst.msk [vmem:[%s1730_s6 + $0xe0] sm:$0xff] %vm466_vm2, %v459_v25  ;;  %496 = vst.msk [vmem:[%s1730_s6 + $0xe8] sm:$0xff] %vm466_vm2, %v461_v26 }
 0x1e1   :  { %v563_v37 = vpop.xlane.xlu0 %562  ;;  %v565_v43 = vpop.xlane.xlu1 %564 }
 0x1e2   :  { %614 = vst.msk [vmem:[%s1731_s7 + $0x60] sm:$0xff] %vm466_vm2, %v563_v37  ;;  %615 = vst.msk [vmem:[%s1731_s7 + $0x68] sm:$0xff] %vm466_vm2, %v565_v43 }
 0x1e5   :  { %v595_v38 = vpop.xlane.xlu0 %594  ;;  %v597_v44 = vpop.xlane.xlu1 %596 }
 0x1e6   :  { %630 = vst.msk [vmem:[%s1731_s7 + $0xe0] sm:$0xff] %vm466_vm2, %v595_v38  ;;  %631 = vst.msk [vmem:[%s1731_s7 + $0xe8] sm:$0xff] %vm466_vm2, %v597_v44 }
 0x1e9   :  { %v599_v27 = vpop.xlane.xlu0 %598  ;;  %v601_v29 = vpop.xlane.xlu1 %600 }
 0x1ea   :  { %632 = vst.msk [vmem:[%s1731_s7 + $0xf0] sm:$0xff] %vm466_vm2, %v599_v27  ;;  %633 = vst.msk [vmem:[%s1731_s7 + $0xf8] sm:$0xff] %vm466_vm2, %v601_v29 }
 0x1eb   :  { %1116 = dma.done.wait [#allocation3], 2048  }
 0x1ec   :  { %1117 = vsyncadd [#allocation3], 4294965248 }
 0x1ed   :  { %817 = vsyncpa [#allocation3], 1 }

</bundles_post_ra>
